<compile_context>
chip_gen: v5e
topology: v5e:2x2
jax: 0.10.0
libtpu: 0.0.40
codegen_flags: <defaults>
</compile_context>

<pallas_src>
import functools
import random

import numpy as np
import jax
import jax.numpy as jnp
from jax.experimental import pallas as pl
from jax.experimental.pallas import tpu as pltpu

LANE = 128
MAX_TILE = 512
VMEM_LIMIT = 48 * 1024 * 1024   # headroom under v7x's 64 MiB per-TC VMEM


def _round_up(x, m):
    return (x + m - 1) // m * m


def _node_padding(n):
    """Padded node count and square tile size for the N x N adjacency."""
    if n <= MAX_TILE:
        n_pad = max(_round_up(n, LANE), LANE)
        return n_pad, n_pad
    return _round_up(n, MAX_TILE), MAX_TILE


def _pad2d(x, rows, cols, dtype=jnp.float32):
    out = jnp.zeros((rows, cols), dtype)
    return out.at[: x.shape[0], : x.shape[1]].set(x.astype(dtype))


# ----------------------------------------------------------------------------
# Pallas kernels
# ----------------------------------------------------------------------------
def _linear_kernel(x_ref, w_ref, b_ref, o_ref, *, relu):
    acc = jnp.dot(x_ref[...], w_ref[...], preferred_element_type=jnp.float32)
    acc = acc + b_ref[...]
    if relu:
        acc = jnp.maximum(acc, 0.0)
    o_ref[...] = acc.astype(o_ref.dtype)


@functools.partial(jax.jit, static_argnames=("relu", "out_dtype", "tile_rows"))
def linear_pallas(x, w, b, *, relu=False, out_dtype=jnp.float32, tile_rows=LANE):
    n, f_in = x.shape
    f_out = w.shape[1]
    grid = (n // tile_rows,)
    flops = 2 * n * f_in * f_out
    bytes_acc = int(x.size * x.dtype.itemsize + w.size * w.dtype.itemsize
                    + b.size * 4 + n * f_out * jnp.dtype(out_dtype).itemsize)
    return pl.pallas_call(
        functools.partial(_linear_kernel, relu=relu),
        out_shape=jax.ShapeDtypeStruct((n, f_out), out_dtype),
        grid_spec=pltpu.PrefetchScalarGridSpec(
            num_scalar_prefetch=0,
            grid=grid,
            in_specs=[
                pl.BlockSpec((tile_rows, f_in), lambda i: (i, 0)),
                pl.BlockSpec((f_in, f_out), lambda i: (0, 0)),   # weights resident
                pl.BlockSpec((1, f_out), lambda i: (0, 0)),      # bias resident
            ],
            out_specs=pl.BlockSpec((tile_rows, f_out), lambda i: (i, 0)),
        ),
        compiler_params=pltpu.CompilerParams(
            dimension_semantics=("parallel",), vmem_limit_bytes=VMEM_LIMIT),
        cost_estimate=pl.CostEstimate(flops=flops, transcendentals=0,
                                      bytes_accessed=bytes_acc),
    )(x, w, b)


def _gcn_aggregate_kernel(a_ref, m_ref, b_ref, o_ref, acc_ref, *, tile_k, relu):
    k = pl.program_id(1)

    @pl.when(k == 0)
    def _():
        acc_ref[...] = jnp.zeros_like(acc_ref)

    off = pl.multiple_of(k * tile_k, tile_k)
    m_blk = m_ref[pl.ds(off, tile_k), :]
    acc_ref[...] += jnp.dot(a_ref[...], m_blk, preferred_element_type=jnp.float32)

    @pl.when(k == pl.num_programs(1) - 1)
    def _():
        out = acc_ref[...] + b_ref[...]
        if relu:
            out = jnp.maximum(out, 0.0)
        o_ref[...] = out.astype(o_ref.dtype)


@functools.partial(jax.jit, static_argnames=("relu", "tile"))
def gcn_aggregate_pallas(a, m, b, *, relu, tile):
    """out = A_hat @ M + bias (optional ReLU). A tiled (rows x K), M resident."""
    n = a.shape[0]
    f = m.shape[1]
    grid = (n // tile, n // tile)
    flops = 2 * n * n * f
    bytes_acc = int(a.size * a.dtype.itemsize + m.size * m.dtype.itemsize
                    + b.size * 4 + n * f * 4)
    return pl.pallas_call(
        functools.partial(_gcn_aggregate_kernel, tile_k=tile, relu=relu),
        out_shape=jax.ShapeDtypeStruct((n, f), jnp.float32),
        grid_spec=pltpu.PrefetchScalarGridSpec(
            num_scalar_prefetch=0,
            grid=grid,
            in_specs=[
                pl.BlockSpec((tile, tile), lambda i, k: (i, k)),  # A_hat tile (bf16)
                pl.BlockSpec((n, f), lambda i, k: (0, 0)),        # M fully resident
                pl.BlockSpec((1, f), lambda i, k: (0, 0)),        # bias resident
            ],
            out_specs=pl.BlockSpec((tile, f), lambda i, k: (i, 0)),
            scratch_shapes=[pltpu.VMEM((tile, f), jnp.float32)],
        ),
        compiler_params=pltpu.CompilerParams(
            dimension_semantics=("parallel", "arbitrary"),
            vmem_limit_bytes=VMEM_LIMIT),
        cost_estimate=pl.CostEstimate(flops=flops, transcendentals=0,
                                      bytes_accessed=bytes_acc),
    )(a, m, b)


def _mlp_kernel(x_ref, w1_ref, b1_ref, w2_ref, b2_ref, o_ref):
    h = jnp.dot(x_ref[...], w1_ref[...], preferred_element_type=jnp.float32) + b1_ref[...]
    h = jnp.maximum(h, 0.0)
    o = jnp.dot(h, w2_ref[...], preferred_element_type=jnp.float32) + b2_ref[...]
    o_ref[...] = o.astype(o_ref.dtype)


@functools.partial(jax.jit, static_argnames=("tile_rows",))
def mlp_pallas(x, w1, b1, w2, b2, *, tile_rows=LANE):
    n, f_in = x.shape
    h = w1.shape[1]
    f_out = w2.shape[1]
    grid = (n // tile_rows,)
    flops = 2 * n * (f_in * h + h * f_out)
    bytes_acc = int(x.size * 4 + w1.size * 4 + w2.size * 4 + n * f_out * 4)
    return pl.pallas_call(
        _mlp_kernel,
        out_shape=jax.ShapeDtypeStruct((n, f_out), jnp.float32),
        grid_spec=pltpu.PrefetchScalarGridSpec(
            num_scalar_prefetch=0,
            grid=grid,
            in_specs=[
                pl.BlockSpec((tile_rows, f_in), lambda i: (i, 0)),
                pl.BlockSpec((f_in, h), lambda i: (0, 0)),
                pl.BlockSpec((1, h), lambda i: (0, 0)),
                pl.BlockSpec((h, f_out), lambda i: (0, 0)),
                pl.BlockSpec((1, f_out), lambda i: (0, 0)),
            ],
            out_specs=pl.BlockSpec((tile_rows, f_out), lambda i: (i, 0)),
        ),
        compiler_params=pltpu.CompilerParams(
            dimension_semantics=("parallel",), vmem_limit_bytes=VMEM_LIMIT),
        cost_estimate=pl.CostEstimate(flops=flops, transcendentals=0,
                                      bytes_accessed=bytes_acc),
    )(x, w1, b1, w2, b2)


# ----------------------------------------------------------------------------
# Graph helpers (plain JAX)
# ----------------------------------------------------------------------------
def gcn_normalized_adjacency(edge_index, num_nodes):
    """Dense A_hat = D^{-1/2}(A+I)D^{-1/2}, matching PyG gcn_norm defaults."""
    src, dst = edge_index[0], edge_index[1]
    loops = jnp.arange(num_nodes, dtype=src.dtype)
    src = jnp.concatenate([src, loops])
    dst = jnp.concatenate([dst, loops])
    deg = jnp.zeros((num_nodes,), jnp.float32).at[dst].add(1.0)
    dinv = jax.lax.rsqrt(deg)                     # deg >= 1 thanks to self-loops
    norm = dinv[src] * dinv[dst]
    return jnp.zeros((num_nodes, num_nodes), jnp.float32).at[dst, src].add(norm)


def gcn_block_pallas(params, x, edge_index, degree_set, degree_set_size):
    """One GNNEncoder/GNNDecoder block: ReLU(GCNConv) -> GCNConv."""
    n = x.shape[0]
    one_hot = jax.nn.one_hot(degree_set.astype(jnp.int32), degree_set_size,
                             dtype=jnp.float32)
    x_cat = jnp.concatenate([x.astype(jnp.float32), one_hot], axis=1)

    n_pad, tile = _node_padding(n)
    x_pad = _pad2d(x_cat, n_pad, params["w1"].shape[0])
    a = gcn_normalized_adjacency(edge_index, n)
    a_pad = _pad2d(a, n_pad, n_pad, dtype=jnp.bfloat16)   # bf16 A_hat: 1/2 HBM traffic

    zb1 = jnp.zeros((1, params["w1"].shape[1]), jnp.float32)
    zb2 = jnp.zeros((1, params["w2"].shape[1]), jnp.float32)

    # conv1: relu(A_hat @ (X W1) + b1)
    xw1 = linear_pallas(x_pad, params["w1"], zb1,
                        relu=False, out_dtype=jnp.bfloat16, tile_rows=tile)
    h = gcn_aggregate_pallas(a_pad, xw1, params["b1"], relu=True, tile=tile)
    # conv2: A_hat @ (H W2) + b2
    hw2 = linear_pallas(h, params["w2"], zb2,
                        relu=False, out_dtype=jnp.bfloat16, tile_rows=tile)
    out = gcn_aggregate_pallas(a_pad, hw2, params["b2"], relu=False, tile=tile)
    return out[:n, : params["out_c"]]


def edge_predictor_pallas(params, feats):
    n = feats.shape[0]
    n_pad, tile = _node_padding(n)
    x_pad = _pad2d(feats.astype(jnp.float32), n_pad, params["w1"].shape[0])
    out = mlp_pallas(x_pad, params["w1"], params["b1"], params["w2"], params["b2"],
                     tile_rows=tile)
    return out[:n, 0]


# ----------------------------------------------------------------------------
# Parameter initialization (PyG GCNConv: glorot W, zero bias; MLP: uniform W)
# ----------------------------------------------------------------------------
def _glorot(key, shape):
    lim = float(np.sqrt(6.0 / (shape[0] + shape[1])))
    return jax.random.uniform(key, shape, jnp.float32, -lim, lim)


def init_gcn_params(in_c, out_c, key):
    hid = 2 * out_c
    in_p, hid_p, out_p = (_round_up(in_c, LANE), _round_up(hid, LANE),
                          _round_up(out_c, LANE))
    k1, k2 = jax.random.split(key)
    return dict(w1=_pad2d(_glorot(k1, (in_c, hid)), in_p, hid_p),
                b1=jnp.zeros((1, hid_p), jnp.float32),
                w2=_pad2d(_glorot(k2, (hid, out_c)), hid_p, out_p),
                b2=jnp.zeros((1, out_p), jnp.float32),
                in_c=in_c, hid=hid, out_c=out_c)


def init_mlp_params(in_c, hid, out_c, key):
    in_p, hid_p, out_p = (_round_up(in_c, LANE), _round_up(hid, LANE),
                          _round_up(out_c, LANE))
    k1, k2 = jax.random.split(key)
    lim1, lim2 = 1.0 / np.sqrt(in_c), 1.0 / np.sqrt(hid)
    w1 = _pad2d(jax.random.uniform(k1, (in_c, hid), jnp.float32, -lim1, lim1),
                in_p, hid_p)
    w2 = _pad2d(jax.random.uniform(k2, (hid, out_c), jnp.float32, -lim2, lim2),
                hid_p, out_p)
    return dict(w1=w1, b1=jnp.zeros((1, hid_p), jnp.float32),
                w2=w2, b2=jnp.zeros((1, out_p), jnp.float32),
                in_c=in_c, hid=hid, out_c=out_c)


# ----------------------------------------------------------------------------
# Plain-JAX f32 references (for correctness checks)
# ----------------------------------------------------------------------------
def gcn_block_ref(params, x, edge_index, degree_set, degree_set_size):
    n = x.shape[0]
    one_hot = jax.nn.one_hot(degree_set.astype(jnp.int32), degree_set_size,
                             dtype=jnp.float32)
    x_cat = jnp.concatenate([x.astype(jnp.float32), one_hot], axis=1)
    a = gcn_normalized_adjacency(edge_index, n)
    w1 = params["w1"][: params["in_c"], : params["hid"]]
    b1 = params["b1"][:, : params["hid"]]
    w2 = params["w2"][: params["hid"], : params["out_c"]]
    b2 = params["b2"][:, : params["out_c"]]
    h = jnp.maximum(a @ (x_cat @ w1) + b1, 0.0)
    return a @ (h @ w2) + b2


def edge_predictor_ref(params, feats):
    w1 = params["w1"][: params["in_c"], : params["hid"]]
    b1 = params["b1"][:, : params["hid"]]
    w2 = params["w2"][: params["hid"], : params["out_c"]]
    b2 = params["b2"][:, : params["out_c"]]
    h = jnp.maximum(feats @ w1 + b1, 0.0)
    return (h @ w2 + b2)[:, 0]


# ----------------------------------------------------------------------------
# GraphES model
# ----------------------------------------------------------------------------
class GraphESPallas:
    """JAX/Pallas port of GraphES: forward = forward_diffusion + reverse_process."""

    def __init__(self, node_features, degree_set_size, key):
        self.node_features = node_features
        self.degree_set_size = degree_set_size
        k_enc, k_dec, k_ep1, k_ep2 = jax.random.split(key, 4)
        self.enc = init_gcn_params(node_features + degree_set_size, 128, k_enc)
        self.dec = init_gcn_params(128 + degree_set_size, node_features, k_dec)
        self.ep1 = init_mlp_params(128, 64, 1, k_ep1)
        # TODO(synk): the PyTorch forward feeds cat([z, z[e1].flatten()]) (128+256
        # features) into nn.Linear(128 + 2, 64), which is shape-incompatible; we
        # follow the declared layer and condition on the two edge endpoints instead.
        self.ep2 = init_mlp_params(128 + 2, 64, 1, k_ep2)

    # --- graph noise process (host-side, mirrors the PyTorch control flow) ---
    @staticmethod
    def edge_swap(edge_index_np, rng):
        num_edges = edge_index_np.shape[1]
        e1, e2 = rng.sample(range(num_edges), 2)
        a, b = int(edge_index_np[0, e1]), int(edge_index_np[1, e1])
        c, d = int(edge_index_np[0, e2]), int(edge_index_np[1, e2])
        if rng.random() > 0.5:
            edge_index_np[:, e1] = (a, d)
            edge_index_np[:, e2] = (c, b)
        else:
            edge_index_np[:, e1] = (a, c)
            edge_index_np[:, e2] = (b, d)
        return edge_index_np

    def forward_diffusion(self, x, edge_index_np, degree_set, timesteps, rng):
        z = gcn_block_pallas(self.enc, x, jnp.asarray(edge_index_np), degree_set,
                             self.degree_set_size)
        for _ in range(timesteps):
            edge_index_np = self.edge_swap(edge_index_np, rng)
        return z, edge_index_np

    def reverse_process(self, z, edge_index_np, degree_set, timesteps, rng):
        n = z.shape[0]
        for _ in range(timesteps):
            scores1 = edge_predictor_pallas(self.ep1, z)
            # argmax over node scores used as an edge index, exactly as in the spec
            idx1 = int(jnp.argmax(scores1))
            e1 = (int(edge_index_np[0, idx1]), int(edge_index_np[1, idx1]))
            cond = jnp.concatenate(
                [z, jnp.broadcast_to(jnp.asarray(e1, jnp.float32)[None, :], (n, 2))],
                axis=1)
            scores2 = edge_predictor_pallas(self.ep2, cond)
            idx2 = int(jnp.argmax(scores2))
            e2 = (int(edge_index_np[0, idx2]), int(edge_index_np[1, idx2]))
            (a, b), (c, d) = e1, e2
            if rng.random() > 0.5:
                edge_index_np[:, idx1] = (a, d)
                edge_index_np[:, idx2] = (c, b)
            else:
                edge_index_np[:, idx1] = (a, c)
                edge_index_np[:, idx2] = (b, d)
        decoded = gcn_block_pallas(self.dec, z, jnp.asarray(edge_index_np),
                                   degree_set, self.degree_set_size)
        return decoded, edge_index_np

    def forward(self, x, edge_index, degree_set, timesteps, seed=0):
        rng = random.Random(seed)
        edge_np = np.asarray(edge_index).copy()
        z, edge_np = self.forward_diffusion(x, edge_np, degree_set, timesteps, rng)
        decoded, edge_np = self.reverse_process(z, edge_np, degree_set, timesteps, rng)
        return decoded, jnp.asarray(edge_np)


# ----------------------------------------------------------------------------
if __name__ == "__main__":
    key = jax.random.PRNGKey(0)
    k_x, k_e, k_d, k_p = jax.random.split(key, 4)

    num_nodes = 16
    node_features = 16
    degree_set_size = 8
    num_edges = 40       # > num_nodes so the spec's argmax-as-edge-index is valid
    timesteps = 2

    x = jax.random.normal(k_x, (num_nodes, node_features), jnp.float32)
    edge_index = jax.random.randint(k_e, (2, num_edges), 0, num_nodes,
                                    dtype=jnp.int32)
    degree_set = jax.random.randint(k_d, (num_nodes,), 0, degree_set_size,
                                    dtype=jnp.int32)

    model = GraphESPallas(node_features, degree_set_size, k_p)

    recon_x, recon_edges = model.forward(x, edge_index, degree_set, timesteps, seed=0)
    recon_x = jax.block_until_ready(recon_x)
    assert recon_x.shape == (num_nodes, node_features)
    assert recon_edges.shape == (2, num_edges)

    # --- correctness of every Pallas kernel vs. plain-JAX f32 references ---
    def rel_err(got, ref):
        return float(jnp.max(jnp.abs(got - ref)) /
                     jnp.maximum(jnp.max(jnp.abs(ref)), 1e-6))

    z_pl = gcn_block_pallas(model.enc, x, edge_index, degree_set, degree_set_size)
    z_rf = gcn_block_ref(model.enc, x, edge_index, degree_set, degree_set_size)
    assert rel_err(z_pl, z_rf) < 5e-2, f"encoder err {rel_err(z_pl, z_rf)}"

    d_pl = gcn_block_pallas(model.dec, z_rf, recon_edges, degree_set, degree_set_size)
    d_rf = gcn_block_ref(model.dec, z_rf, recon_edges, degree_set, degree_set_size)
    assert rel_err(d_pl, d_rf) < 5e-2, f"decoder err {rel_err(d_pl, d_rf)}"

    s1_pl = edge_predictor_pallas(model.ep1, z_rf)
    s1_rf = edge_predictor_ref(model.ep1, z_rf)
    assert rel_err(s1_pl, s1_rf) < 1e-3, f"ep1 err {rel_err(s1_pl, s1_rf)}"

    cond = jnp.concatenate([z_rf, jnp.full((num_nodes, 2), 3.0, jnp.float32)], axis=1)
    s2_pl = edge_predictor_pallas(model.ep2, cond)
    s2_rf = edge_predictor_ref(model.ep2, cond)
    assert rel_err(s2_pl, s2_rf) < 1e-3, f"ep2 err {rel_err(s2_pl, s2_rf)}"

    print("KERNEL_OK")
</pallas_src>

<mosaic_0001>
module attributes {stable_mosaic.version = 11 : i64} {
  func.func @_linear_kernel(%arg0: i32, %arg1: memref<128x128xf32, #tpu.memory_space<vmem>>, %arg2: memref<128x256xf32, #tpu.memory_space<vmem>>, %arg3: memref<1x256xf32, #tpu.memory_space<vmem>>, %arg4: memref<128x256xbf16, #tpu.memory_space<vmem>>) attributes {dimension_semantics = [#tpu.dimension_semantics<parallel>], iteration_bounds = array<i64: 1>, scalar_prefetch = 0 : i64, scratch_operands = 0 : i64, tpu.core_type = #tpu.core_type<tc>, window_params = [{transform_indices = @transform_0, window_bounds = array<i64: 128, 128>}, {pipeline_mode = #tpu.pipeline_mode<synchronous>, transform_indices = @transform_1, window_bounds = array<i64: 128, 256>}, {pipeline_mode = #tpu.pipeline_mode<synchronous>, transform_indices = @transform_2, window_bounds = array<i64: 1, 256>}, {transform_indices = @transform_3, window_bounds = array<i64: 128, 256>}]} {
    %c0 = arith.constant 0 : index
    %c0_0 = arith.constant 0 : index
    %0 = vector.load %arg1[%c0, %c0_0] : memref<128x128xf32, #tpu.memory_space<vmem>>, vector<128x128xf32>
    %c0_1 = arith.constant 0 : index
    %c0_2 = arith.constant 0 : index
    %1 = vector.load %arg2[%c0_1, %c0_2] : memref<128x256xf32, #tpu.memory_space<vmem>>, vector<128x256xf32>
    %cst = arith.constant dense<0.000000e+00> : vector<128x256xf32>
    %2 = tpu.matmul %0, %1, %cst {dimension_numbers = #tpu.dot_dimension_numbers<[1], [0], [0], [1], [0, 0, 1, 1], [], []>} : vector<128x128xf32>, vector<128x256xf32>, vector<128x256xf32> -> vector<128x256xf32>
    %c0_3 = arith.constant 0 : index
    %c0_4 = arith.constant 0 : index
    %3 = vector.load %arg3[%c0_3, %c0_4] : memref<1x256xf32, #tpu.memory_space<vmem>>, vector<1x256xf32>
    %4 = vector.broadcast %3 : vector<1x256xf32> to vector<128x256xf32>
    %5 = arith.addf %2, %4 : vector<128x256xf32>
    %6 = arith.truncf %5 : vector<128x256xf32> to vector<128x256xbf16>
    %c0_5 = arith.constant 0 : index
    %c0_6 = arith.constant 0 : index
    %7 = vector.load %arg4[%c0_5, %c0_6] : memref<128x256xbf16, #tpu.memory_space<vmem>>, vector<128x256xbf16>
    tpu.vector_store %arg4[%c0_5, %c0_6], %6 {strides = array<i32>} : memref<128x256xbf16, #tpu.memory_space<vmem>>, vector<128x256xbf16>,
    return
  }
  func.func @transform_0(%arg0: i32) -> (i32, i32) {
    %c0_i32 = arith.constant 0 : i32
    %c0_i32_0 = arith.constant 0 : i32
    return %arg0, %c0_i32 : i32, i32
  }
  func.func @transform_1(%arg0: i32) -> (i32, i32) {
    %c0_i32 = arith.constant 0 : i32
    %c0_i32_0 = arith.constant 0 : i32
    %c0_i32_1 = arith.constant 0 : i32
    return %c0_i32, %c0_i32_0 : i32, i32
  }
  func.func @transform_2(%arg0: i32) -> (i32, i32) {
    %c0_i32 = arith.constant 0 : i32
    %c0_i32_0 = arith.constant 0 : i32
    %c0_i32_1 = arith.constant 0 : i32
    return %c0_i32, %c0_i32_0 : i32, i32
  }
  func.func @transform_3(%arg0: i32) -> (i32, i32) {
    %c0_i32 = arith.constant 0 : i32
    %c0_i32_0 = arith.constant 0 : i32
    return %arg0, %c0_i32 : i32, i32
  }
}

</mosaic_0001>

<bundles_post_ra>
// kernel: linear_pallas.1
= control target key start
LH: loop header
LB: loop body
LE: loop exit
PB: predicated region body
PF: predicated region fallthrough
CT: control target
= control target key end

     0   :  { %8 = vsyncpa [#allocation3], 0  ;;  %s520_s0 = inlined_call_operand.hbm [shape: f32[128,128], index: 0, kind: input, shape index: {}]   ;;  %s521_s1 = inlined_call_operand.hbm [shape: f32[128,256], index: 1, kind: input, shape index: {}]   ;;  %s522_s2 = inlined_call_operand.hbm [shape: f32[1,256], index: 2, kind: input, shape index: {}]   ;;  %s523_s3 = inlined_call_operand.hbm [shape: bf16[128,256], index: 3, kind: output, shape index: {}]  }
   0x1   :  { %9 = vsyncpa [#allocation6], 0  ;;  %s28_s14 = sshll.u32 %s521_s1, 4  ;;  %s29_s14 = int_to_ptr.hbm [resolvable:$true] %s28_s14 }
   0x2   :  { %10 = vsyncpa [#allocation4], 0  ;;  %s438_s15 = smov [#allocation5]   ;;  %s15_s19 = sshll.u32 %s520_s0, 4  ;;  %s16_s19 = int_to_ptr.hbm [resolvable:$true] %s15_s19 }
   0x3   :  { %s30_s16 = sshll.u32 %s438_s15, 4  ;;  %s439_s20 = smov 256   ;;  %s31_s16 = int_to_ptr.vmem [resolvable:$true] %s30_s16 }
   0x4   :  { %s440_s21 = smov 16   ;;  %s441_s22 = smov [#allocation2]  }
   0x5   :  { %36 = dma.hbm_to_vmem [thread:$0]  %s29_s14, 4096, %s31_s16, [#allocation6], %s439_s20, %s439_s20, %s440_s21  }
   0x6   :  { %s17_s23 = sshll.u32 %s441_s22, 4  ;;  %s442_s24 = smov 128   ;;  %s18_s23 = int_to_ptr.vmem [resolvable:$true] %s17_s23 }
   0x7   :  { %s443_s25 = smov 8   ;;  %s42_s27 = sshll.u32 %s522_s2, 4  ;;  %s43_s27 = int_to_ptr.hbm [resolvable:$true] %s42_s27 }
   0x8   :  { %23 = dma.hbm_to_vmem [thread:$0]  %s16_s19, 2048, %s18_s23, [#allocation3], %s442_s24, %s442_s24, %s443_s25  }
   0x9   :  { %s444_s28 = smov [#allocation7]  }
   0xa   :  { %s44_s0 = sshll.u32 %s444_s28, 4  ;;  %s45_s0 = int_to_ptr.vmem [resolvable:$true] %s44_s0 }
   0xb   :  { %47 = dma.hbm_to_vmem [thread:$0]  %s43_s27, 32, %s45_s0, [#allocation6]  }
   0xc   :  { %432 = dma.done.wait [#allocation3], 2048  }
   0xd   :  { %433 = vsyncadd [#allocation3], 4294965248 }
   0xe   :  { %434 = dma.done.wait [#allocation6], 4128  }
   0xf   :  { %435 = vsyncadd [#allocation6], 4294963168  ;;  %v106_v0 = vld [vmem:[#allocation5 + $0xf0] sm:$0xff]  ;;  %v107_v1 = vld [vmem:[#allocation5 + $0xf8] sm:$0xff]  ;;  %s445_s2 = smov [#allocation8]   ;;  %s282_s5 = sshll.u32 %s523_s3, 4  ;;  %s283_s5 = int_to_ptr.hbm [resolvable:$true] %s282_s5 }
  0x10   :  { %v104_v2 = vld [vmem:[#allocation5 + $0xe0] sm:$0xff]  ;;  %296 = vmatpush.msra.mxu2 %v106_v0  ;;  %312 = vmatpush.msra.mxu3 %v107_v1  ;;  %v105_v3 = vld [vmem:[#allocation5 + $0xe8] sm:$0xff]  ;;  %v102_v4 = vld [vmem:[#allocation5 + $0xd0] sm:$0xff]  ;;  %s280_s29 = sshll.u32 %s445_s2, 4  ;;  %s281_s29 = int_to_ptr.vmem [resolvable:$true] %s280_s29 }
  0x11   :  { %v103_v5 = vld [vmem:[#allocation5 + $0xd8] sm:$0xff]  ;;  %114 = vmatpush.msra.mxu0 %v106_v0  ;;  %179 = vmatpush.msra.mxu1 %v107_v1  ;;  %v100_v6 = vld [vmem:[#allocation5 + $0xc0] sm:$0xff]  ;;  %v101_v7 = vld [vmem:[#allocation5 + $0xc8] sm:$0xff] }
  0x12   :  { %297 = vmatpush.msra.mxu2 %v104_v2  ;;  %313 = vmatpush.msra.mxu3 %v105_v3  ;;  %v98_v8 = vld [vmem:[#allocation5 + $0xb0] sm:$0xff]  ;;  %v99_v9 = vld [vmem:[#allocation5 + $0xb8] sm:$0xff]  ;;  %v96_v10 = vld [vmem:[#allocation5 + $0xa0] sm:$0xff] }
  0x13   :  { %115 = vmatpush.msra.mxu0 %v104_v2  ;;  %180 = vmatpush.msra.mxu1 %v105_v3  ;;  %v97_v11 = vld [vmem:[#allocation5 + $0xa8] sm:$0xff]  ;;  %v94_v12 = vld [vmem:[#allocation5 + $0x90] sm:$0xff]  ;;  %v95_v13 = vld [vmem:[#allocation5 + $0x98] sm:$0xff] }
  0x14   :  { %298 = vmatpush.msra.mxu2 %v102_v4  ;;  %314 = vmatpush.msra.mxu3 %v103_v5  ;;  %v92_v14 = vld [vmem:[#allocation5 + $0x80] sm:$0xff]  ;;  %v93_v15 = vld [vmem:[#allocation5 + $0x88] sm:$0xff]  ;;  %v90_v16 = vld [vmem:[#allocation5 + $0x70] sm:$0xff] }
  0x15   :  { %116 = vmatpush.msra.mxu0 %v102_v4  ;;  %181 = vmatpush.msra.mxu1 %v103_v5  ;;  %v91_v17 = vld [vmem:[#allocation5 + $0x78] sm:$0xff]  ;;  %v88_v18 = vld [vmem:[#allocation5 + $0x60] sm:$0xff]  ;;  %v89_v19 = vld [vmem:[#allocation5 + $0x68] sm:$0xff] }
  0x16   :  { %299 = vmatpush.msra.mxu2 %v100_v6  ;;  %315 = vmatpush.msra.mxu3 %v101_v7  ;;  %v86_v20 = vld [vmem:[#allocation5 + $0x50] sm:$0xff]  ;;  %v87_v21 = vld [vmem:[#allocation5 + $0x58] sm:$0xff]  ;;  %v84_v22 = vld [vmem:[#allocation5 + $0x40] sm:$0xff] }
  0x17   :  { %117 = vmatpush.msra.mxu0 %v100_v6  ;;  %182 = vmatpush.msra.mxu1 %v101_v7  ;;  %v85_v23 = vld [vmem:[#allocation5 + $0x48] sm:$0xff]  ;;  %v82_v24 = vld [vmem:[#allocation5 + $0x30] sm:$0xff]  ;;  %v83_v25 = vld [vmem:[#allocation5 + $0x38] sm:$0xff] }
  0x18   :  { %300 = vmatpush.msra.mxu2 %v98_v8  ;;  %316 = vmatpush.msra.mxu3 %v99_v9  ;;  %v80_v26 = vld [vmem:[#allocation5 + $0x20] sm:$0xff]  ;;  %v81_v27 = vld [vmem:[#allocation5 + $0x28] sm:$0xff]  ;;  %v78_v28 = vld [vmem:[#allocation5 + $0x10] sm:$0xff] }
  0x19   :  { %118 = vmatpush.msra.mxu0 %v98_v8  ;;  %183 = vmatpush.msra.mxu1 %v99_v9  ;;  %v79_v29 = vld [vmem:[#allocation5 + $0x18] sm:$0xff]  ;;  %v76_v30 = vld [vmem:[#allocation5] sm:$0xff]  ;;  %v77_v31 = vld [vmem:[#allocation5 + $0x8] sm:$0xff] }
  0x1a   :  { %301 = vmatpush.msra.mxu2 %v96_v10  ;;  %317 = vmatpush.msra.mxu3 %v97_v11  ;;  %v68_v32 = vld [vmem:[#allocation2 + $0x40] sm:$0xff]  ;;  %v69_v34 = vld [vmem:[#allocation2 + $0x48] sm:$0xff]  ;;  %v70_v36 = vld [vmem:[#allocation2 + $0x50] sm:$0xff] }
  0x1b   :  { %119 = vmatpush.msra.mxu0 %v96_v10  ;;  %184 = vmatpush.msra.mxu1 %v97_v11  ;;  %v60_v33 = vld [vmem:[#allocation2] sm:$0xff]  ;;  %v61_v35 = vld [vmem:[#allocation2 + $0x8] sm:$0xff]  ;;  %v62_v37 = vld [vmem:[#allocation2 + $0x10] sm:$0xff] }
  0x1c   :  { %302 = vmatpush.msra.mxu2 %v94_v12  ;;  %318 = vmatpush.msra.mxu3 %v95_v13  ;;  %v71_v38 = vld [vmem:[#allocation2 + $0x58] sm:$0xff]  ;;  %v72_v40 = vld [vmem:[#allocation2 + $0x60] sm:$0xff]  ;;  %v73_v42 = vld [vmem:[#allocation2 + $0x68] sm:$0xff] }
  0x1d   :  { %120 = vmatpush.msra.mxu0 %v94_v12  ;;  %185 = vmatpush.msra.mxu1 %v95_v13  ;;  %v63_v39 = vld [vmem:[#allocation2 + $0x18] sm:$0xff]  ;;  %v64_v41 = vld [vmem:[#allocation2 + $0x20] sm:$0xff]  ;;  %v65_v43 = vld [vmem:[#allocation2 + $0x28] sm:$0xff] }
  0x1e   :  { %303 = vmatpush.msra.mxu2 %v92_v14  ;;  %319 = vmatpush.msra.mxu3 %v93_v15  ;;  %v74_v44 = vld [vmem:[#allocation2 + $0x70] sm:$0xff]  ;;  %v75_v46 = vld [vmem:[#allocation2 + $0x78] sm:$0xff]  ;;  %v108_v48 = vld [vmem:[#allocation7] sm:$0x3] }
  0x1f   :  { %121 = vmatpush.msra.mxu0 %v92_v14  ;;  %186 = vmatpush.msra.mxu1 %v93_v15  ;;  %v66_v45 = vld [vmem:[#allocation2 + $0x30] sm:$0xff]  ;;  %v67_v47 = vld [vmem:[#allocation2 + $0x38] sm:$0xff]  ;;  %v478_v49 = vperm.slane %v108_v48, 0  ;;  %v480_v50 = vperm.slane %v108_v48, 1 }
  0x20   :  { %304 = vmatpush.msra.mxu2 %v90_v16  ;;  %320 = vmatpush.msra.mxu3 %v91_v17 }
  0x21   :  { %122 = vmatpush.msra.mxu0 %v90_v16  ;;  %187 = vmatpush.msra.mxu1 %v91_v17 }
  0x22   :  { %305 = vmatpush.msra.mxu2 %v88_v18  ;;  %321 = vmatpush.msra.mxu3 %v89_v19 }
  0x23   :  { %123 = vmatpush.msra.mxu0 %v88_v18  ;;  %188 = vmatpush.msra.mxu1 %v89_v19 }
  0x24   :  { %306 = vmatpush.msra.mxu2 %v86_v20  ;;  %322 = vmatpush.msra.mxu3 %v87_v21 }
  0x25   :  { %124 = vmatpush.msra.mxu0 %v86_v20  ;;  %189 = vmatpush.msra.mxu1 %v87_v21 }
  0x26   :  { %307 = vmatpush.msra.mxu2 %v84_v22  ;;  %323 = vmatpush.msra.mxu3 %v85_v23 }
  0x27   :  { %125 = vmatpush.msra.mxu0 %v84_v22  ;;  %190 = vmatpush.msra.mxu1 %v85_v23 }
  0x28   :  { %308 = vmatpush.msra.mxu2 %v82_v24  ;;  %324 = vmatpush.msra.mxu3 %v83_v25 }
  0x29   :  { %126 = vmatpush.msra.mxu0 %v82_v24  ;;  %191 = vmatpush.msra.mxu1 %v83_v25 }
  0x2a   :  { %309 = vmatpush.msra.mxu2 %v80_v26  ;;  %325 = vmatpush.msra.mxu3 %v81_v27 }
  0x2b   :  { %127 = vmatpush.msra.mxu0 %v80_v26  ;;  %192 = vmatpush.msra.mxu1 %v81_v27 }
  0x2c   :  { %310 = vmatpush.msra.mxu2 %v78_v28  ;;  %326 = vmatpush.msra.mxu3 %v79_v29 }
  0x2d   :  { %128 = vmatpush.msra.mxu0 %v78_v28  ;;  %193 = vmatpush.msra.mxu1 %v79_v29 }
  0x2e   :  { %311 = vmatpush.msra.mxu2 %v76_v30  ;;  %327 = vmatpush.msra.mxu3 %v77_v31 }
  0x2f   :  { %154 = vmatmul.f32.vlgmr.msra.gmra.mxu2 %v68_v32  ;;  %219 = vmatmul.f32.vlgmr.msra.gmra.mxu3 %v68_v32 }
  0x30   :  { %129 = vmatpush.msra.mxu0 %v76_v30  ;;  %194 = vmatpush.msra.mxu1 %v77_v31 }
  0x31   :  { %130 = vmatmul.f32.vlgmr.msra.gmra.mxu0 %v60_v33  ;;  %195 = vmatmul.f32.vlgmr.msra.gmra.mxu1 %v60_v33 }
  0x37   :  { %157 = vmatmul.f32.gmra.mxu2 %v69_v34  ;;  %222 = vmatmul.f32.gmra.mxu3 %v69_v34 }
  0x39   :  { %133 = vmatmul.f32.gmra.mxu0 %v61_v35  ;;  %198 = vmatmul.f32.gmra.mxu1 %v61_v35 }
  0x3f   :  { %160 = vmatmul.f32.gmra.mxu2 %v70_v36  ;;  %225 = vmatmul.f32.gmra.mxu3 %v70_v36 }
  0x41   :  { %136 = vmatmul.f32.gmra.mxu0 %v62_v37  ;;  %201 = vmatmul.f32.gmra.mxu1 %v62_v37 }
  0x47   :  { %163 = vmatmul.f32.gmra.mxu2 %v71_v38  ;;  %228 = vmatmul.f32.gmra.mxu3 %v71_v38 }
  0x49   :  { %139 = vmatmul.f32.gmra.mxu0 %v63_v39  ;;  %204 = vmatmul.f32.gmra.mxu1 %v63_v39 }
  0x4f   :  { %166 = vmatmul.f32.gmra.mxu2 %v72_v40  ;;  %231 = vmatmul.f32.gmra.mxu3 %v72_v40 }
  0x51   :  { %142 = vmatmul.f32.gmra.mxu0 %v64_v41  ;;  %207 = vmatmul.f32.gmra.mxu1 %v64_v41 }
  0x57   :  { %169 = vmatmul.f32.gmra.mxu2 %v73_v42  ;;  %234 = vmatmul.f32.gmra.mxu3 %v73_v42 }
  0x59   :  { %145 = vmatmul.f32.gmra.mxu0 %v65_v43  ;;  %210 = vmatmul.f32.gmra.mxu1 %v65_v43 }
  0x5f   :  { %172 = vmatmul.f32.gmra.mxu2 %v74_v44  ;;  %237 = vmatmul.f32.gmra.mxu3 %v74_v44 }
  0x61   :  { %148 = vmatmul.f32.gmra.mxu0 %v66_v45  ;;  %213 = vmatmul.f32.gmra.mxu1 %v66_v45 }
  0x67   :  { %175 = vmatmul.f32.gmra.mxu2 %v75_v46  ;;  %240 = vmatmul.f32.gmra.mxu3 %v75_v46 }
  0x69   :  { %151 = vmatmul.f32.gmra.mxu0 %v67_v47  ;;  %216 = vmatmul.f32.gmra.mxu1 %v67_v47 }
  0xae   :  { %v131_v51 = vpop.f32.mrf.mxu0  ;;  %v196_v52 = vpop.f32.mrf.mxu1 }
  0xaf   :  { %v132_v53 = vadd.f32 %v131_v51, %v478_v49  ;;  %v197_v54 = vadd.f32 %v196_v52, %v480_v50 }
  0xb1   :  { %v244_v55 = vpack.c.bf16 %v197_v54, %v132_v53 }
  0xb2   :  { %v155_v56 = vpop.f32.mrf.mxu2  ;;  %v220_v57 = vpop.f32.mrf.mxu3 }
  0xb3   :  { %v156_v58 = vadd.f32 %v155_v56, %v478_v49  ;;  %260 = vst [vmem:[#allocation8] sm:$0xff] %v244_v55  ;;  %v221_v59 = vadd.f32 %v220_v57, %v480_v50 }
  0xb5   :  { %v252_v60 = vpack.c.bf16 %v221_v59, %v156_v58 }
  0xb6   :  { %v134_v61 = vpop.f32.mrf.mxu0  ;;  %v199_v62 = vpop.f32.mrf.mxu1 }
  0xb7   :  { %268 = vst [vmem:[#allocation8 + $0x40] sm:$0xff] %v252_v60  ;;  %v135_v63 = vadd.f32 %v134_v61, %v478_v49  ;;  %v200_v0 = vadd.f32 %v199_v62, %v480_v50 }
  0xb9   :  { %v245_v1 = vpack.c.bf16 %v200_v0, %v135_v63 }
  0xba   :  { %v158_v2 = vpop.f32.mrf.mxu2  ;;  %v223_v3 = vpop.f32.mrf.mxu3 }
  0xbb   :  { %v159_v4 = vadd.f32 %v158_v2, %v478_v49  ;;  %261 = vst [vmem:[#allocation8 + $0x8] sm:$0xff] %v245_v1  ;;  %v224_v5 = vadd.f32 %v223_v3, %v480_v50 }
  0xbd   :  { %v253_v6 = vpack.c.bf16 %v224_v5, %v159_v4 }
  0xbe   :  { %v137_v7 = vpop.f32.mrf.mxu0  ;;  %v202_v8 = vpop.f32.mrf.mxu1 }
  0xbf   :  { %269 = vst [vmem:[#allocation8 + $0x48] sm:$0xff] %v253_v6  ;;  %v138_v9 = vadd.f32 %v137_v7, %v478_v49  ;;  %v203_v10 = vadd.f32 %v202_v8, %v480_v50 }
  0xc1   :  { %v246_v11 = vpack.c.bf16 %v203_v10, %v138_v9 }
  0xc2   :  { %v161_v12 = vpop.f32.mrf.mxu2  ;;  %v226_v13 = vpop.f32.mrf.mxu3 }
  0xc3   :  { %v162_v14 = vadd.f32 %v161_v12, %v478_v49  ;;  %262 = vst [vmem:[#allocation8 + $0x10] sm:$0xff] %v246_v11  ;;  %v227_v15 = vadd.f32 %v226_v13, %v480_v50 }
  0xc5   :  { %v254_v16 = vpack.c.bf16 %v227_v15, %v162_v14 }
  0xc6   :  { %v140_v17 = vpop.f32.mrf.mxu0  ;;  %v205_v18 = vpop.f32.mrf.mxu1 }
  0xc7   :  { %270 = vst [vmem:[#allocation8 + $0x50] sm:$0xff] %v254_v16  ;;  %v141_v19 = vadd.f32 %v140_v17, %v478_v49  ;;  %v206_v20 = vadd.f32 %v205_v18, %v480_v50 }
  0xc9   :  { %v247_v21 = vpack.c.bf16 %v206_v20, %v141_v19 }
  0xca   :  { %v164_v22 = vpop.f32.mrf.mxu2  ;;  %v229_v23 = vpop.f32.mrf.mxu3 }
  0xcb   :  { %v165_v24 = vadd.f32 %v164_v22, %v478_v49  ;;  %263 = vst [vmem:[#allocation8 + $0x18] sm:$0xff] %v247_v21  ;;  %v230_v25 = vadd.f32 %v229_v23, %v480_v50 }
  0xcd   :  { %v255_v26 = vpack.c.bf16 %v230_v25, %v165_v24 }
  0xce   :  { %v143_v27 = vpop.f32.mrf.mxu0  ;;  %v208_v28 = vpop.f32.mrf.mxu1 }
  0xcf   :  { %271 = vst [vmem:[#allocation8 + $0x58] sm:$0xff] %v255_v26  ;;  %v144_v29 = vadd.f32 %v143_v27, %v478_v49  ;;  %v209_v30 = vadd.f32 %v208_v28, %v480_v50 }
  0xd1   :  { %v248_v31 = vpack.c.bf16 %v209_v30, %v144_v29 }
  0xd2   :  { %v167_v32 = vpop.f32.mrf.mxu2  ;;  %v232_v33 = vpop.f32.mrf.mxu3 }
  0xd3   :  { %v168_v34 = vadd.f32 %v167_v32, %v478_v49  ;;  %264 = vst [vmem:[#allocation8 + $0x20] sm:$0xff] %v248_v31  ;;  %v233_v35 = vadd.f32 %v232_v33, %v480_v50 }
  0xd5   :  { %v256_v36 = vpack.c.bf16 %v233_v35, %v168_v34 }
  0xd6   :  { %v146_v37 = vpop.f32.mrf.mxu0  ;;  %v211_v38 = vpop.f32.mrf.mxu1 }
  0xd7   :  { %272 = vst [vmem:[#allocation8 + $0x60] sm:$0xff] %v256_v36  ;;  %v147_v39 = vadd.f32 %v146_v37, %v478_v49  ;;  %v212_v40 = vadd.f32 %v211_v38, %v480_v50 }
  0xd9   :  { %v249_v41 = vpack.c.bf16 %v212_v40, %v147_v39 }
  0xda   :  { %v170_v42 = vpop.f32.mrf.mxu2  ;;  %v235_v43 = vpop.f32.mrf.mxu3 }
  0xdb   :  { %v171_v44 = vadd.f32 %v170_v42, %v478_v49  ;;  %265 = vst [vmem:[#allocation8 + $0x28] sm:$0xff] %v249_v41  ;;  %v236_v45 = vadd.f32 %v235_v43, %v480_v50 }
  0xdd   :  { %v257_v46 = vpack.c.bf16 %v236_v45, %v171_v44 }
  0xde   :  { %v149_v47 = vpop.f32.mrf.mxu0  ;;  %v214_v48 = vpop.f32.mrf.mxu1 }
  0xdf   :  { %273 = vst [vmem:[#allocation8 + $0x68] sm:$0xff] %v257_v46  ;;  %v150_v51 = vadd.f32 %v149_v47, %v478_v49  ;;  %v215_v52 = vadd.f32 %v214_v48, %v480_v50 }
  0xe1   :  { %v250_v53 = vpack.c.bf16 %v215_v52, %v150_v51 }
  0xe2   :  { %v173_v54 = vpop.f32.mrf.mxu2  ;;  %v238_v55 = vpop.f32.mrf.mxu3 }
  0xe3   :  { %v174_v56 = vadd.f32 %v173_v54, %v478_v49  ;;  %266 = vst [vmem:[#allocation8 + $0x30] sm:$0xff] %v250_v53  ;;  %v239_v57 = vadd.f32 %v238_v55, %v480_v50 }
  0xe5   :  { %v258_v58 = vpack.c.bf16 %v239_v57, %v174_v56 }
  0xe6   :  { %v152_v59 = vpop.f32.mrf.mxu0  ;;  %v217_v60 = vpop.f32.mrf.mxu1 }
  0xe7   :  { %274 = vst [vmem:[#allocation8 + $0x70] sm:$0xff] %v258_v58  ;;  %v153_v61 = vadd.f32 %v152_v59, %v478_v49  ;;  %v218_v62 = vadd.f32 %v217_v60, %v480_v50 }
  0xe9   :  { %v251_v63 = vpack.c.bf16 %v218_v62, %v153_v61 }
  0xea   :  { %v176_v0 = vpop.f32.mrf.mxu2  ;;  %v241_v1 = vpop.f32.mrf.mxu3 }
  0xeb   :  { %v177_v2 = vadd.f32 %v176_v0, %v478_v49  ;;  %267 = vst [vmem:[#allocation8 + $0x38] sm:$0xff] %v251_v63  ;;  %v242_v3 = vadd.f32 %v241_v1, %v480_v50 }
  0xed   :  { %v259_v4 = vpack.c.bf16 %v242_v3, %v177_v2 }
  0xef   :  { %275 = vst [vmem:[#allocation8 + $0x78] sm:$0xff] %v259_v4 }
  0xf0   :  { %288 = dma.vmem_to_hbm [thread:$0]  %s281_s29, 2048, %s283_s5, [#allocation4], %s442_s24, %s442_s24, %s443_s25  }
  0xf1   :  { %436 = dma.done.wait [#allocation4], 2048  }
  0xf2   :  { %437 = vsyncadd [#allocation4], 4294965248 }
  0xf3   :  { %293 = vsyncpa [#allocation3], 1 }
  0xf4   :  { %294 = vsyncpa [#allocation6], 1 }
  0xf5   :  { %295 = vsyncpa [#allocation4], 1 }

</bundles_post_ra>
